<compile_context>
chip_gen: v6e
topology: v6e:2x2x1
jax: 0.10.0
libtpu: 0.0.40
codegen_flags: <defaults>
</compile_context>

<pallas_src>
import jax
import jax.numpy as jnp
from jax.experimental import pallas as pl
from jax.experimental.pallas import tpu as pltpu

_LANE = 128


def _mish(x):
    # mish(x) = x * tanh(softplus(x)) = x * (t - 1) / (t + 1),  t = (1 + e^x)^2
    # Single EUP exp + near-free approx reciprocal (vs exp + log + tanh).
    # Clamp the exponent input: for x > 20, tanh(softplus(x)) == 1 to f32 precision.
    e = jnp.exp(jnp.minimum(x, 20.0))
    t = (1.0 + e) * (1.0 + e)
    return x * (t - 1.0) * pl.reciprocal(t + 1.0, approx=True)


def resnet_block_kernel(x_ref, w1_ref, b1_ref, wcat_ref, bcat_ref, o_ref):
    x = x_ref[...]                                    # (TB, n_in_p) f32
    # residual branch stage 1: Mish -> Linear1 -> Mish   (elementwise in f32)
    h = _mish(x)
    h = jnp.dot(h.astype(jnp.bfloat16), w1_ref[...],
                preferred_element_type=jnp.float32) + b1_ref[...]
    h = _mish(h)
    # stage 2 + identity branch fused: [mish(h1), x] @ [w2; wid] + (b2 + bid)
    hc = jnp.concatenate([h.astype(jnp.bfloat16), x.astype(jnp.bfloat16)],
                         axis=-1)                     # (TB, n_out_p + n_in_p)
    out = jnp.dot(hc, wcat_ref[...],
                  preferred_element_type=jnp.float32) + bcat_ref[...]
    o_ref[...] = out.astype(o_ref.dtype)


def _round_up(v, m):
    return ((v + m - 1) // m) * m


def resnet_block(x, w1, b1, w2, b2, wid, bid, *, block_b=256):
    B, n_in = x.shape
    n_out = w1.shape[1]

    # Pad feature dims to lane-dense multiples of 128. Zero padding preserves
    # the math exactly (padded rows/cols contribute 0; mish(0) == 0).
    n_in_p = _round_up(n_in, _LANE)
    n_out_p = _round_up(n_out, _LANE)

    xp = jnp.pad(x, ((0, 0), (0, n_in_p - n_in)))
    w1p = jnp.pad(w1, ((0, n_in_p - n_in), (0, n_out_p - n_out))).astype(jnp.bfloat16)
    b1p = jnp.pad(b1, ((0, 0), (0, n_out_p - n_out)))
    w2p = jnp.pad(w2, ((0, n_out_p - n_out), (0, n_out_p - n_out)))
    widp = jnp.pad(wid, ((0, n_in_p - n_in), (0, n_out_p - n_out)))
    # Fuse identity matmul into the second matmul along K.
    wcat = jnp.concatenate([w2p, widp], axis=0).astype(jnp.bfloat16)  # (n_out_p+n_in_p, n_out_p)
    bcat = jnp.pad(b2 + bid, ((0, 0), (0, n_out_p - n_out)))

    # Batch tiling: pipeline x/out over the grid, keep weights VMEM-resident.
    tb = min(block_b, max(8, _round_up(B, 8)))
    B_p = _round_up(B, tb)
    xp = jnp.pad(xp, ((0, B_p - B), (0, 0)))
    grid = (B_p // tb,)

    out = pl.pallas_call(
        resnet_block_kernel,
        out_shape=jax.ShapeDtypeStruct((B_p, n_out_p), x.dtype),
        grid_spec=pltpu.PrefetchScalarGridSpec(
            num_scalar_prefetch=0,
            grid=grid,
            in_specs=[
                pl.BlockSpec((tb, n_in_p), lambda i: (i, 0)),               # x
                pl.BlockSpec((n_in_p, n_out_p), lambda i: (0, 0)),          # w1 (resident)
                pl.BlockSpec((1, n_out_p), lambda i: (0, 0)),               # b1 (resident)
                pl.BlockSpec((n_out_p + n_in_p, n_out_p), lambda i: (0, 0)),# [w2; wid] (resident)
                pl.BlockSpec((1, n_out_p), lambda i: (0, 0)),               # b2 + bid (resident)
            ],
            out_specs=pl.BlockSpec((tb, n_out_p), lambda i: (i, 0)),
        ),
        compiler_params=pltpu.CompilerParams(
            dimension_semantics=("parallel",),
        ),
    )(xp, w1p, b1p, wcat, bcat)
    return out[:B, :n_out]


def resnet_block_ref(x, w1, b1, w2, b2, wid, bid):
    # Pure-f32 JAX reference for correctness checking (exact mish).
    def mish(v):
        return v * jnp.tanh(jnp.logaddexp(v, 0.0))
    h = mish(x)
    h = h @ w1 + b1
    h = mish(h)
    h = h @ w2 + b2
    ident = x @ wid + bid
    return ident + h


if __name__ == "__main__":
    key = jax.random.PRNGKey(0)
    batch, neurons_in, neurons_out = 8, 32, 64

    k_x, k_w1, k_b1, k_w2, k_b2, k_wid, k_bid = jax.random.split(key, 7)
    x = jax.random.normal(k_x, (batch, neurons_in), dtype=jnp.float32)

    # Deterministic parameter init (PyTorch-like uniform(-1/sqrt(fan_in), +...)).
    def init_linear(kw, kb, fan_in, fan_out):
        bound = 1.0 / jnp.sqrt(fan_in)
        w = jax.random.uniform(kw, (fan_in, fan_out), jnp.float32, -bound, bound)
        b = jax.random.uniform(kb, (1, fan_out), jnp.float32, -bound, bound)
        return w, b

    w1, b1 = init_linear(k_w1, k_b1, neurons_in, neurons_out)
    w2, b2 = init_linear(k_w2, k_b2, neurons_out, neurons_out)
    wid, bid = init_linear(k_wid, k_bid, neurons_in, neurons_out)

    out = resnet_block(x, w1, b1, w2, b2, wid, bid)
    out = jax.block_until_ready(out)

    ref = resnet_block_ref(x, w1, b1, w2, b2, wid, bid)
    assert out.shape == (batch, neurons_out), out.shape
    # bf16 MXU operands + approx reciprocal in mish -> loosened tolerance vs f32 ref.
    assert jnp.allclose(out, ref, atol=5e-2, rtol=5e-2), (
        "mismatch vs JAX reference; max abs err = "
        f"{float(jnp.max(jnp.abs(out - ref)))}")

    print("KERNEL_OK")
</pallas_src>

<mosaic_0001>
module attributes {stable_mosaic.version = 11 : i64} {
  func.func @resnet_block_kernel(%arg0: i32, %arg1: memref<8x128xf32, #tpu.memory_space<vmem>>, %arg2: memref<128x128xbf16, #tpu.memory_space<vmem>>, %arg3: memref<1x128xf32, #tpu.memory_space<vmem>>, %arg4: memref<256x128xbf16, #tpu.memory_space<vmem>>, %arg5: memref<1x128xf32, #tpu.memory_space<vmem>>, %arg6: memref<8x128xf32, #tpu.memory_space<vmem>>) attributes {dimension_semantics = [#tpu.dimension_semantics<parallel>], iteration_bounds = array<i64: 1>, scalar_prefetch = 0 : i64, scratch_operands = 0 : i64, tpu.core_type = #tpu.core_type<tc>, window_params = [{transform_indices = @transform_0, window_bounds = array<i64: 8, 128>}, {pipeline_mode = #tpu.pipeline_mode<synchronous>, transform_indices = @transform_1, window_bounds = array<i64: 128, 128>}, {pipeline_mode = #tpu.pipeline_mode<synchronous>, transform_indices = @transform_2, window_bounds = array<i64: 1, 128>}, {pipeline_mode = #tpu.pipeline_mode<synchronous>, transform_indices = @transform_3, window_bounds = array<i64: 256, 128>}, {pipeline_mode = #tpu.pipeline_mode<synchronous>, transform_indices = @transform_4, window_bounds = array<i64: 1, 128>}, {transform_indices = @transform_5, window_bounds = array<i64: 8, 128>}]} {
    %c0 = arith.constant 0 : index
    %c0_0 = arith.constant 0 : index
    %0 = vector.load %arg1[%c0, %c0_0] : memref<8x128xf32, #tpu.memory_space<vmem>>, vector<8x128xf32>
    %cst = arith.constant 2.000000e+01 : f32
    %1 = vector.broadcast %cst : f32 to vector<8x128xf32>
    %2 = arith.minimumf %0, %1 : vector<8x128xf32>
    %3 = math.exp %2 : vector<8x128xf32>
    %cst_1 = arith.constant 1.000000e+00 : f32
    %4 = vector.broadcast %cst_1 : f32 to vector<8x128xf32>
    %5 = arith.addf %4, %3 : vector<8x128xf32>
    %cst_2 = arith.constant 1.000000e+00 : f32
    %6 = vector.broadcast %cst_2 : f32 to vector<8x128xf32>
    %7 = arith.addf %6, %3 : vector<8x128xf32>
    %8 = arith.mulf %5, %7 : vector<8x128xf32>
    %cst_3 = arith.constant 1.000000e+00 : f32
    %9 = vector.broadcast %cst_3 : f32 to vector<8x128xf32>
    %10 = arith.subf %8, %9 : vector<8x128xf32>
    %11 = arith.mulf %0, %10 : vector<8x128xf32>
    %cst_4 = arith.constant 1.000000e+00 : f32
    %12 = vector.broadcast %cst_4 : f32 to vector<8x128xf32>
    %13 = arith.addf %8, %12 : vector<8x128xf32>
    %14 = tpu.reciprocal %13 {approx = true} : vector<8x128xf32> -> vector<8x128xf32>
    %15 = arith.mulf %11, %14 : vector<8x128xf32>
    %16 = arith.truncf %15 : vector<8x128xf32> to vector<8x128xbf16>
    %c0_5 = arith.constant 0 : index
    %c0_6 = arith.constant 0 : index
    %17 = vector.load %arg2[%c0_5, %c0_6] : memref<128x128xbf16, #tpu.memory_space<vmem>>, vector<128x128xbf16>
    %cst_7 = arith.constant dense<0.000000e+00> : vector<8x128xf32>
    %18 = tpu.matmul %16, %17, %cst_7 {dimension_numbers = #tpu.dot_dimension_numbers<[1], [0], [0], [1], [0, 0, 1, 1], [], []>} : vector<8x128xbf16>, vector<128x128xbf16>, vector<8x128xf32> -> vector<8x128xf32>
    %c0_8 = arith.constant 0 : index
    %c0_9 = arith.constant 0 : index
    %19 = vector.load %arg3[%c0_8, %c0_9] : memref<1x128xf32, #tpu.memory_space<vmem>>, vector<1x128xf32>
    %20 = vector.broadcast %19 : vector<1x128xf32> to vector<8x128xf32>
    %21 = arith.addf %18, %20 : vector<8x128xf32>
    %cst_10 = arith.constant 2.000000e+01 : f32
    %22 = vector.broadcast %cst_10 : f32 to vector<8x128xf32>
    %23 = arith.minimumf %21, %22 : vector<8x128xf32>
    %24 = math.exp %23 : vector<8x128xf32>
    %cst_11 = arith.constant 1.000000e+00 : f32
    %25 = vector.broadcast %cst_11 : f32 to vector<8x128xf32>
    %26 = arith.addf %25, %24 : vector<8x128xf32>
    %cst_12 = arith.constant 1.000000e+00 : f32
    %27 = vector.broadcast %cst_12 : f32 to vector<8x128xf32>
    %28 = arith.addf %27, %24 : vector<8x128xf32>
    %29 = arith.mulf %26, %28 : vector<8x128xf32>
    %cst_13 = arith.constant 1.000000e+00 : f32
    %30 = vector.broadcast %cst_13 : f32 to vector<8x128xf32>
    %31 = arith.subf %29, %30 : vector<8x128xf32>
    %32 = arith.mulf %21, %31 : vector<8x128xf32>
    %cst_14 = arith.constant 1.000000e+00 : f32
    %33 = vector.broadcast %cst_14 : f32 to vector<8x128xf32>
    %34 = arith.addf %29, %33 : vector<8x128xf32>
    %35 = tpu.reciprocal %34 {approx = true} : vector<8x128xf32> -> vector<8x128xf32>
    %36 = arith.mulf %32, %35 : vector<8x128xf32>
    %37 = arith.truncf %36 : vector<8x128xf32> to vector<8x128xbf16>
    %38 = arith.truncf %0 : vector<8x128xf32> to vector<8x128xbf16>
    %39 = tpu.concatenate %37, %38 in 1 : vector<8x128xbf16>, vector<8x128xbf16> -> vector<8x256xbf16>
    %c0_15 = arith.constant 0 : index
    %c0_16 = arith.constant 0 : index
    %40 = vector.load %arg4[%c0_15, %c0_16] : memref<256x128xbf16, #tpu.memory_space<vmem>>, vector<256x128xbf16>
    %cst_17 = arith.constant dense<0.000000e+00> : vector<8x128xf32>
    %41 = tpu.matmul %39, %40, %cst_17 {dimension_numbers = #tpu.dot_dimension_numbers<[1], [0], [0], [1], [0, 0, 1, 1], [], []>} : vector<8x256xbf16>, vector<256x128xbf16>, vector<8x128xf32> -> vector<8x128xf32>
    %c0_18 = arith.constant 0 : index
    %c0_19 = arith.constant 0 : index
    %42 = vector.load %arg5[%c0_18, %c0_19] : memref<1x128xf32, #tpu.memory_space<vmem>>, vector<1x128xf32>
    %43 = vector.broadcast %42 : vector<1x128xf32> to vector<8x128xf32>
    %44 = arith.addf %41, %43 : vector<8x128xf32>
    %c0_20 = arith.constant 0 : index
    %c0_21 = arith.constant 0 : index
    %45 = vector.load %arg6[%c0_20, %c0_21] : memref<8x128xf32, #tpu.memory_space<vmem>>, vector<8x128xf32>
    tpu.vector_store %arg6[%c0_20, %c0_21], %44 {strides = array<i32>} : memref<8x128xf32, #tpu.memory_space<vmem>>, vector<8x128xf32>,
    return
  }
  func.func @transform_0(%arg0: i32) -> (i32, i32) {
    %c0_i32 = arith.constant 0 : i32
    %c0_i32_0 = arith.constant 0 : i32
    return %arg0, %c0_i32 : i32, i32
  }
  func.func @transform_1(%arg0: i32) -> (i32, i32) {
    %c0_i32 = arith.constant 0 : i32
    %c0_i32_0 = arith.constant 0 : i32
    %c0_i32_1 = arith.constant 0 : i32
    return %c0_i32, %c0_i32_0 : i32, i32
  }
  func.func @transform_2(%arg0: i32) -> (i32, i32) {
    %c0_i32 = arith.constant 0 : i32
    %c0_i32_0 = arith.constant 0 : i32
    %c0_i32_1 = arith.constant 0 : i32
    return %c0_i32, %c0_i32_0 : i32, i32
  }
  func.func @transform_3(%arg0: i32) -> (i32, i32) {
    %c0_i32 = arith.constant 0 : i32
    %c0_i32_0 = arith.constant 0 : i32
    %c0_i32_1 = arith.constant 0 : i32
    return %c0_i32, %c0_i32_0 : i32, i32
  }
  func.func @transform_4(%arg0: i32) -> (i32, i32) {
    %c0_i32 = arith.constant 0 : i32
    %c0_i32_0 = arith.constant 0 : i32
    %c0_i32_1 = arith.constant 0 : i32
    return %c0_i32, %c0_i32_0 : i32, i32
  }
  func.func @transform_5(%arg0: i32) -> (i32, i32) {
    %c0_i32 = arith.constant 0 : i32
    %c0_i32_0 = arith.constant 0 : i32
    return %arg0, %c0_i32 : i32, i32
  }
}

</mosaic_0001>

<bundles_post_ra>
// kernel: tpu_custom_call.1
= control target key start
LH: loop header
LB: loop body
LE: loop exit
PB: predicated region body
PF: predicated region fallthrough
CT: control target
= control target key end

     0   :  { %10 = vsyncpa [#allocation3], 0  ;;  %s649_s0 = inlined_call_operand.hbm [shape: f32[8,128], index: 0, kind: input, shape index: {}]   ;;  %s650_s1 = inlined_call_operand.hbm [shape: bf16[128,128], index: 1, kind: input, shape index: {}]   ;;  %s651_s2 = inlined_call_operand.vmem [shape: f32[1,128], index: 2, kind: input, shape index: {}]   ;;  %s652_s3 = inlined_call_operand.hbm [shape: bf16[256,128], index: 3, kind: input, shape index: {}]   ;;  %s653_s4 = inlined_call_operand.vmem [shape: f32[1,128], index: 4, kind: input, shape index: {}]   ;;  %s654_s5 = inlined_call_operand.hbm [shape: f32[8,128], index: 5, kind: output, shape index: {}]  }
   0x1   :  { %11 = vsyncpa [#allocation6], 0 }
   0x2   :  { %12 = vsyncpa [#allocation4], 0  ;;  %s593_s18 = smov [#allocation5]  }
   0x3   :  { %s28_s19 = sshll.u32 %s593_s18, 4  ;;  %s29_s19 = int_to_ptr.vmem [resolvable:$true] %s28_s19 }
   0x4   :  { %s515_s20 = scalar_lea.vmem %s29_s19, 1024  ;;  %p520_p1 = scmp.lt.s32.totalorder %s29_s19, %s29_s19 }
   0x5   :  { %p516_p0 = scmp.ne.s32.totalorder %s29_s19, %s515_s20  ;;  %p521_p2 = scmp.lt.s32.totalorder %s515_s20, %s515_s20 }
   0x7   :  { %p522_p3 = por %p521_p2, %p520_p1 }
   0x9   :  { %p523_p4 = pnand %p522_p3, %p516_p0 }
   0xb   :  { %526 = shalt.err (!%p523_p4)
}
   0xc   :  { %s594_s21 = smov 64   ;;  %s595_s22 = smov 4  }
   0xd   :  { %34 = dma.hbm_to_vmem [thread:$0]  %s650_s1, 1024, %s29_s19, [#allocation6], %s594_s21, %s594_s21, %s595_s22  }
   0xe   :  { %s596_s25 = smov [#allocation2]   ;;  %s597_s27 = smov [#allocation7]  }
   0xf   :  { %s19_s26 = sshll.u32 %s596_s25, 4  ;;  %s42_s28 = sshll.u32 %s597_s27, 4  ;;  %s20_s26 = int_to_ptr.vmem [resolvable:$true] %s19_s26  ;;  %s43_s28 = int_to_ptr.vmem [resolvable:$true] %s42_s28 }
  0x10   :  { %s535_s29 = scalar_lea.vmem %s20_s26, 128  ;;  %p540_p6 = scmp.lt.s32.totalorder %s20_s26, %s20_s26 }
  0x11   :  { %p536_p5 = scmp.ne.s32.totalorder %s20_s26, %s535_s29  ;;  %p541_p7 = scmp.lt.s32.totalorder %s535_s29, %s535_s29 }
  0x13   :  { %p542_p8 = por %p541_p7, %p540_p6 }
  0x15   :  { %p543_p9 = pnand %p542_p8, %p536_p5 }
  0x17   :  { %546 = shalt.err (!%p543_p9)
}
  0x18   :  { %22 = dma.hbm_to_vmem [thread:$0]  %s649_s0, 128, %s20_s26, [#allocation3]  }
  0x19   :  { %s555_s7 = scalar_lea.vmem %s43_s28, 2048  ;;  %p560_p11 = scmp.lt.s32.totalorder %s43_s28, %s43_s28 }
  0x1a   :  { %p556_p10 = scmp.ne.s32.totalorder %s43_s28, %s555_s7  ;;  %p561_p12 = scmp.lt.s32.totalorder %s555_s7, %s555_s7 }
  0x1c   :  { %p562_p13 = por %p561_p12, %p560_p11 }
  0x1e   :  { %p563_p0 = pnand %p562_p13, %p556_p10 }
  0x20   :  { %566 = shalt.err (!%p563_p0)
}
  0x21   :  { %48 = dma.hbm_to_vmem [thread:$0]  %s652_s3, 2048, %s43_s28, [#allocation6], %s594_s21, %s594_s21, %s595_s22  }
  0x22   :  { %587 = dma.done.wait [#allocation3], 128  }
  0x23   :  { %588 = vsyncadd [#allocation3], 4294967168 }
  0x24   :  { %589 = dma.done.wait [#allocation6], 3072  }
  0x25   :  { %590 = vsyncadd [#allocation6], 4294964224  ;;  %v598_v0 = vmov 0.0   ;;  %vm599_vm0 = vmmov 0   ;;  %v475_v1 = vld [vmem:[#allocation5 + $0x38] sm:$0xff]   ;;  %v476_v2 = vld [vmem:[#allocation5 + $0x30] sm:$0xff]  }
  0x26   :  { %447 = vmatprep.subr.bf16.mxu0 %v598_v0  ;;  %463 = vmatprep.mubr.msk.bf16.mxu0 %vm599_vm0, %v598_v0  ;;  %v477_v3 = vld [vmem:[#allocation5 + $0x28] sm:$0xff]   ;;  %v61_v4 = vld [vmem:[#allocation2] sm:$0xff]  ;;  %v478_v5 = vld [vmem:[#allocation5 + $0x20] sm:$0xff]   ;;  %s600_s10 = smov [#allocation8]  }
  0x27   :  { %448 = vmatpush3.bf16.msra.mxu0 %v475_v1  ;;  %v62_v6 = vmin.f32 %v61_v4, 20.0  ;;  %v479_v8 = vld [vmem:[#allocation5 + $0x18] sm:$0xff]   ;;  %v480_v9 = vld [vmem:[#allocation5 + $0x10] sm:$0xff]   ;;  %v481_v10 = vld [vmem:[#allocation5 + $0x8] sm:$0xff]   ;;  %v195_v32 = vpack.c.bf16 %v61_v4, %v61_v4  ;;  %s378_s11 = sshll.u32 %s600_s10, 4  ;;  %s379_s11 = int_to_ptr.vmem [resolvable:$true] %s378_s11 }
  0x28   :  { %449 = vmatprep.subr.bf16.mxu0 %v598_v0  ;;  %v482_v12 = vld [vmem:[#allocation5] sm:$0xff]   ;;  %v483_v21 = vld [vmem:[#allocation7 + $0x78] sm:$0xff]   ;;  %v485_v23 = vld [vmem:[#allocation7 + $0x70] sm:$0xff]   ;;  %s567_s12 = scalar_lea.vmem %s379_s11, 128  ;;  %p572_p2 = scmp.lt.s32.totalorder %s379_s11, %s379_s11 }
  0x29   :  { %v63_v7 = vmul.f32 1.442695, %v62_v6  ;;  %v484_v22 = vld [vmem:[#allocation7 + $0x38] sm:$0xff]   ;;  %425 = vmatprep.subr.bf16.mxu1 %v483_v21  ;;  %v486_v24 = vld [vmem:[#allocation7 + $0x30] sm:$0xff]   ;;  %v487_v25 = vld [vmem:[#allocation7 + $0x68] sm:$0xff]   ;;  %363 = vmatprep.mubr.bf16.mxu1 %v195_v32  ;;  %p568_p1 = scmp.ne.s32.totalorder %s379_s11, %s567_s12  ;;  %p573_p3 = scmp.lt.s32.totalorder %s567_s12, %s567_s12 }
  0x2a   :  { %426 = vmatpush3.bf16.msra.mxu1 %v484_v22  ;;  %v488_v26 = vld [vmem:[#allocation7 + $0x28] sm:$0xff]   ;;  %v489_v27 = vld [vmem:[#allocation7 + $0x60] sm:$0xff]   ;;  %v491_v29 = vld [vmem:[#allocation7 + $0x58] sm:$0xff]  }
  0x2b   :  { %450 = vmatpush3.bf16.msra.mxu0 %v476_v2  ;;  %499 = vpow2.f32 %v63_v7  ;;  %427 = vmatprep.subr.bf16.mxu1 %v485_v23  ;;  %v490_v28 = vld [vmem:[#allocation7 + $0x20] sm:$0xff]   ;;  %v492_v30 = vld [vmem:[#allocation7 + $0x18] sm:$0xff]   ;;  %v493_v31 = vld [vmem:[#allocation7 + $0x50] sm:$0xff]   ;;  %p574_p4 = por %p573_p3, %p572_p2 }
  0x2c   :  { %451 = vmatprep.subr.bf16.mxu0 %v598_v0  ;;  %v494_v33 = vld [vmem:[#allocation7 + $0x10] sm:$0xff]   ;;  %v495_v34 = vld [vmem:[#allocation7 + $0x48] sm:$0xff]   ;;  %v497_v36 = vld [vmem:[#allocation7 + $0x40] sm:$0xff]  }
  0x2d   :  { %v496_v35 = vld [vmem:[#allocation7 + $0x8] sm:$0xff]   ;;  %v498_v37 = vld [vmem:[#allocation7] sm:$0xff]   ;;  %v389_v38 = vld [vmem:[%s651_s2] ss:$0 sm:$0xff]  ;;  %p575_p5 = pnand %p574_p4, %p568_p1 }
  0x2e   :  { %428 = vmatpush3.bf16.msra.mxu1 %v486_v24  ;;  %v399_v56 = vld [vmem:[%s653_s4] ss:$0 sm:$0xff] }
  0x2f   :  { %452 = vmatpush3.bf16.msra.mxu0 %v477_v3  ;;  %429 = vmatprep.subr.bf16.mxu1 %v487_v25 }
  0x30   :  { %453 = vmatprep.subr.bf16.mxu0 %v598_v0 }
  0x32   :  { %430 = vmatpush3.bf16.msra.mxu1 %v488_v26 }
  0x33   :  { %454 = vmatpush3.bf16.msra.mxu0 %v478_v5  ;;  %431 = vmatprep.subr.bf16.mxu1 %v489_v27 }
  0x34   :  { %455 = vmatprep.subr.bf16.mxu0 %v598_v0 }
  0x36   :  { %432 = vmatpush3.bf16.msra.mxu1 %v490_v28 }
  0x37   :  { %456 = vmatpush3.bf16.msra.mxu0 %v479_v8  ;;  %433 = vmatprep.subr.bf16.mxu1 %v491_v29 }
  0x38   :  { %457 = vmatprep.subr.bf16.mxu0 %v598_v0  ;;  %v500_v11 = vpop.eup %499 }
  0x39   :  { %v65_v13 = vadd.f32 1.0, %v500_v11 }
  0x3a   :  { %434 = vmatpush3.bf16.msra.mxu1 %v492_v30 }
  0x3b   :  { %458 = vmatpush3.bf16.msra.mxu0 %v480_v9  ;;  %v66_v14 = vmul.f32 %v65_v13, %v65_v13  ;;  %435 = vmatprep.subr.bf16.mxu1 %v493_v31 }
  0x3c   :  { %459 = vmatprep.subr.bf16.mxu0 %v598_v0 }
  0x3d   :  { %v69_v15 = vadd.f32 1.0, %v66_v14  ;;  %v388_v16 = vadd.f32 -1.0, %v66_v14 }
  0x3e   :  { %436 = vmatpush3.bf16.msra.mxu1 %v494_v33 }
  0x3f   :  { %460 = vmatpush3.bf16.msra.mxu0 %v481_v10  ;;  %501 = vrcp.f32 %v69_v15  ;;  %v68_v17 = vmul.f32 %v388_v16, %v61_v4  ;;  %437 = vmatprep.subr.bf16.mxu1 %v495_v34 }
  0x40   :  { %461 = vmatprep.subr.bf16.mxu0 %v598_v0 }
  0x42   :  { %438 = vmatpush3.bf16.msra.mxu1 %v496_v35 }
  0x43   :  { %462 = vmatpush3.bf16.msra.mxu0 %v482_v12  ;;  %439 = vmatprep.subr.bf16.mxu1 %v497_v36 }
  0x46   :  { %440 = vmatpush3.bf16.msra.mxu1 %v498_v37 }
  0x4c   :  { %v502_v18 = vpop.eup %501 }
  0x4d   :  { %v71_v19 = vmul.f32 %v502_v18, %v68_v17 }
  0x4f   :  { %v72_v20 = vpack.c.bf16 %v71_v19, %v71_v19 }
  0x51   :  { %464 = vmatmul.mubr.bf16.vlgmr.msra.gmra.mxu0 %v72_v20 }
 0x111   :  { %v178_v39 = vpop.f32.mrf.mxu0 }
 0x112   :  { %v179_v40 = vadd.f32 %v389_v38, %v178_v39 }
 0x113   :  { %v465_v41 = vpop.f32.mrf.mxu0 }
 0x114   :  { %v184_v42 = vmin.f32 %v179_v40, 20.0 }
 0x115   :  { %v181_v43 = vpop.f32.mrf.mxu0 }
 0x116   :  { %v185_v44 = vmul.f32 1.442695, %v184_v42 }
 0x117   :  { %v466_v45 = vpop.f32.mrf.mxu0 }
 0x118   :  { %503 = vpow2.f32 %v185_v44 }
 0x125   :  { %v504_v46 = vpop.eup %503 }
 0x126   :  { %v187_v47 = vadd.f32 1.0, %v504_v46 }
 0x128   :  { %v188_v48 = vmul.f32 %v187_v47, %v187_v47 }
 0x12a   :  { %v191_v49 = vadd.f32 1.0, %v188_v48  ;;  %v398_v50 = vadd.f32 -1.0, %v188_v48 }
 0x12c   :  { %505 = vrcp.f32 %v191_v49  ;;  %v190_v51 = vmul.f32 %v398_v50, %v179_v40 }
 0x139   :  { %v506_v52 = vpop.eup %505 }
 0x13a   :  { %v193_v53 = vmul.f32 %v506_v52, %v190_v51 }
 0x13c   :  { %v194_v54 = vpack.c.bf16 %v193_v53, %v193_v53 }
 0x13e   :  { %364 = vmatmul.mubr.bf16.vlgmr.msra.gmra.mxu1 %v194_v54 }
 0x1fe   :  { %v441_v55 = vpop.f32.mrf.mxu1 }
 0x200   :  { %v442_v57 = vpop.f32.mrf.mxu1 }
 0x201   :  { %v443_v58 = vadd.f32 %v442_v57, %v441_v55 }
 0x202   :  { %v444_v59 = vpop.f32.mrf.mxu1 }
 0x203   :  { %v366_v60 = vadd.f32 %v443_v58, %v399_v56 }
 0x204   :  { %v445_v61 = vpop.f32.mrf.mxu1 }
 0x205   :  { %371 = vst [vmem:[#allocation8] sm:$0xff] %v366_v60 }
 0x206   :  { %578 = shalt.err (!%p575_p5)
}
 0x207   :  { %381 = dma.vmem_to_hbm [thread:$0]  %s379_s11, 128, %s654_s5, [#allocation4]  }
 0x208   :  { %591 = dma.done.wait [#allocation4], 128  }
 0x209   :  { %592 = vsyncadd [#allocation4], 4294967168 }
 0x20a   :  { %385 = vsyncpa [#allocation3], 1 }
 0x20b   :  { %386 = vsyncpa [#allocation6], 1 }
 0x20c   :  { %387 = vsyncpa [#allocation4], 1 }

</bundles_post_ra>
